<compile_context>
chip_gen: v7x
topology: tpu7x:2x2x1
jax: 0.10.0
libtpu: 0.0.40
codegen_flags: <defaults>
</compile_context>

<pallas_src>
import functools

import jax
import jax.numpy as jnp
from jax.experimental import pallas as pl
from jax.experimental.pallas import tpu as pltpu


def _round_up(x, m):
    return ((x + m - 1) // m) * m


def policy_net_kernel(x_ref, w1_ref, w2_ref, wh_ref, b_ref, out_ref):
    """One batch tile (batch on lanes) per grid step. Weights/biases VMEM-resident."""
    H1 = w1_ref.shape[0]
    H2 = w2_ref.shape[0]
    two_a = wh_ref.shape[0]
    a = two_a // 2

    xT = x_ref[...]                                   # (S, TB), batch on lane axis

    # Sublane-aligned static slices of the packed bias column; each broadcasts
    # across lanes in the add below (no cross-lane shuffle needed).
    b1 = b_ref[0:H1, :]                               # (H1, 1)
    b2 = b_ref[H1:H1 + H2, :]                         # (H2, 1)
    bh = b_ref[H1 + H2:H1 + H2 + two_a, :]            # (2A, 1)

    # fc1 + ReLU  (MXU matmul, f32 accumulate; elementwise stays f32)
    h1 = jnp.dot(w1_ref[...], xT, preferred_element_type=jnp.float32) + b1
    h1 = jnp.maximum(h1, 0.0)                         # (H1, TB)

    # fc2 + ReLU
    h2 = jnp.dot(w2_ref[...], h1, preferred_element_type=jnp.float32) + b2
    h2 = jnp.maximum(h2, 0.0)                         # (H2, TB)

    # fused mean||log_std head: single matmul + single bias add
    head = jnp.dot(wh_ref[...], h2, preferred_element_type=jnp.float32) + bh  # (2A, TB)

    # mean on sublanes [0, A), std = exp(log_std) on sublanes [A, 2A).
    # Whole-vreg select (no relayout); exp argument is zeroed on mean rows so
    # it cannot overflow there.  exp runs on the EUP (free slot).
    sub = jax.lax.broadcasted_iota(jnp.int32, head.shape, dimension=0)
    is_mean = sub < a
    out = jnp.where(is_mean, head, jnp.exp(jnp.where(is_mean, 0.0, head)))
    out_ref[...] = out.astype(out_ref.dtype)


def pack_params(params):
    """One-time packing (call OUTSIDE the hot forward path / jit of forward).

    params: torch-native layout — w*: (out_features, in_features), b*: (out_features,).
    Returns dict with fused head weight and a single bias column.
    """
    wh = jnp.concatenate([params["wm"], params["ws"]], axis=0)           # (2A, H2)
    b_col = jnp.concatenate(
        [params["b1"], params["b2"], params["bm"], params["bs"]])[:, None]  # (H1+H2+2A, 1)
    return {"w1": params["w1"], "w2": params["w2"], "wh": wh, "b": b_col}


def policy_net_forward(state, packed, *, tile_batch=4096):
    """state: (B, state_dim) f32.  packed: output of pack_params()."""
    B, S = state.shape
    H1 = packed["w1"].shape[0]
    H2 = packed["w2"].shape[0]
    two_a = packed["wh"].shape[0]
    A = two_a // 2
    total_b = H1 + H2 + two_a

    # --- batch tiling on the LANE axis (multiples of 128) -------------------
    tb = min(tile_batch, _round_up(B, 128))
    tb = _round_up(tb, 128)
    B_pad = _round_up(B, tb)

    xT = state.T                                       # (S, B): batch on lanes
    if B_pad != B:
        xT = jnp.pad(xT, ((0, 0), (0, B_pad - B)))
    grid = (B_pad // tb,)

    # --- advisory cost hint --------------------------------------------------
    cost = pl.CostEstimate(
        flops=2 * B_pad * (S * H1 + H1 * H2 + H2 * two_a),
        transcendentals=B_pad * A,
        bytes_accessed=4 * (B_pad * (S + two_a)
                            + S * H1 + H1 * H2 + H2 * two_a + total_b))

    headT = pl.pallas_call(
        policy_net_kernel,
        out_shape=jax.ShapeDtypeStruct((two_a, B_pad), jnp.float32),
        grid=grid,
        in_specs=[
            # activations: tiled over batch (lane axis)
            pl.BlockSpec((S, tb), lambda i: (0, i)),
            # weights / packed bias column: constant block index -> VMEM-resident
            pl.BlockSpec((H1, S), lambda i: (0, 0)),
            pl.BlockSpec((H2, H1), lambda i: (0, 0)),
            pl.BlockSpec((two_a, H2), lambda i: (0, 0)),
            pl.BlockSpec((total_b, 1), lambda i: (0, 0)),
        ],
        out_specs=pl.BlockSpec((two_a, tb), lambda i: (0, i)),
        compiler_params=pltpu.CompilerParams(
            dimension_semantics=("arbitrary",)),
        cost_estimate=cost,
    )(xT, packed["w1"], packed["w2"], packed["wh"], packed["b"])

    out = headT[:, :B].T                               # (B, 2A): one transpose in wrapper
    return out[:, :A], out[:, A:]


def init_params(key, state_dim, hidden_dims, action_dim):
    """Deterministic PyTorch-Linear-style init, torch-native layout:
    weights (out_features, in_features), biases (out_features,)."""
    dims = [(hidden_dims[0], state_dim),
            (hidden_dims[1], hidden_dims[0]),
            (action_dim, hidden_dims[1]),
            (action_dim, hidden_dims[1])]
    names = ["1", "2", "m", "s"]
    params = {}
    for (fan_out, fan_in), name in zip(dims, names):
        key, kw, kb = jax.random.split(key, 3)
        bound = 1.0 / jnp.sqrt(fan_in)
        params["w" + name] = jax.random.uniform(
            kw, (fan_out, fan_in), jnp.float32, -bound, bound)
        params["b" + name] = jax.random.uniform(
            kb, (fan_out,), jnp.float32, -bound, bound)
    return params


def reference_forward(state, params):
    """Pure-JAX reference for correctness check (torch-native weight layout)."""
    h1 = jnp.maximum(state @ params["w1"].T + params["b1"], 0.0)
    h2 = jnp.maximum(h1 @ params["w2"].T + params["b2"], 0.0)
    mean = h2 @ params["wm"].T + params["bm"]
    std = jnp.exp(h2 @ params["ws"].T + params["bs"])
    return mean, std


if __name__ == "__main__":
    key = jax.random.PRNGKey(0)

    # Small shapes consistent with the module: maze state_dim=4,
    # hidden_dims=[32, 32], action_dim=2, batch=8.
    batch, state_dim, hidden_dims, action_dim = 8, 4, (32, 32), 2

    key, kp, kx = jax.random.split(key, 3)
    params = init_params(kp, state_dim, hidden_dims, action_dim)
    packed = pack_params(params)          # one-time packing, out of the hot path
    state = jax.random.normal(kx, (batch, state_dim), jnp.float32)

    fwd = jax.jit(functools.partial(policy_net_forward, tile_batch=4096))
    mean, std = fwd(state, packed)
    jax.block_until_ready((mean, std))

    # Validate against pure-JAX reference.
    mean_ref, std_ref = reference_forward(state, params)
    assert jnp.allclose(mean, mean_ref, atol=1e-5, rtol=1e-5)
    assert jnp.allclose(std, std_ref, atol=1e-5, rtol=1e-5)
    assert mean.shape == (batch, action_dim) and std.shape == (batch, action_dim)
    assert bool(jnp.all(std > 0.0))

    # Also exercise the multi-tile / padded-batch path (grid > 1).
    big_b = 1000
    key, kb = jax.random.split(key)
    big_state = jax.random.normal(kb, (big_b, state_dim), jnp.float32)
    bmean, bstd = jax.jit(functools.partial(policy_net_forward, tile_batch=512))(
        big_state, packed)
    jax.block_until_ready((bmean, bstd))
    bmean_ref, bstd_ref = reference_forward(big_state, params)
    assert jnp.allclose(bmean, bmean_ref, atol=1e-5, rtol=1e-5)
    assert jnp.allclose(bstd, bstd_ref, atol=1e-5, rtol=1e-5)

    print("KERNEL_OK")
</pallas_src>

<mosaic_0001>
module attributes {stable_mosaic.version = 11 : i64} {
  func.func @policy_net_kernel(%arg0: i32, %arg1: memref<4x128xf32, #tpu.memory_space<vmem>>, %arg2: memref<32x4xf32, #tpu.memory_space<vmem>>, %arg3: memref<32x32xf32, #tpu.memory_space<vmem>>, %arg4: memref<4x32xf32, #tpu.memory_space<vmem>>, %arg5: memref<68x1xf32, #tpu.memory_space<vmem>>, %arg6: memref<4x128xf32, #tpu.memory_space<vmem>>) attributes {dimension_semantics = [#tpu.dimension_semantics<arbitrary>], iteration_bounds = array<i64: 1>, scalar_prefetch = 0 : i64, scratch_operands = 0 : i64, tpu.core_type = #tpu.core_type<tc>, window_params = [{transform_indices = @transform_0, window_bounds = array<i64: 4, 128>}, {pipeline_mode = #tpu.pipeline_mode<synchronous>, transform_indices = @transform_1, window_bounds = array<i64: 32, 4>}, {pipeline_mode = #tpu.pipeline_mode<synchronous>, transform_indices = @transform_2, window_bounds = array<i64: 32, 32>}, {pipeline_mode = #tpu.pipeline_mode<synchronous>, transform_indices = @transform_3, window_bounds = array<i64: 4, 32>}, {pipeline_mode = #tpu.pipeline_mode<synchronous>, transform_indices = @transform_4, window_bounds = array<i64: 68, 1>}, {transform_indices = @transform_5, window_bounds = array<i64: 4, 128>}]} {
    %c0 = arith.constant 0 : index
    %c0_0 = arith.constant 0 : index
    %0 = vector.load %arg1[%c0, %c0_0] : memref<4x128xf32, #tpu.memory_space<vmem>>, vector<4x128xf32>
    %c0_1 = arith.constant 0 : index
    %c0_2 = arith.constant 0 : index
    %1 = vector.load %arg5[%c0_1, %c0_2] : memref<68x1xf32, #tpu.memory_space<vmem>>, vector<32x1xf32>
    %c32 = arith.constant 32 : index
    %c0_3 = arith.constant 0 : index
    %2 = vector.load %arg5[%c32, %c0_3] : memref<68x1xf32, #tpu.memory_space<vmem>>, vector<32x1xf32>
    %c64 = arith.constant 64 : index
    %c0_4 = arith.constant 0 : index
    %3 = vector.load %arg5[%c64, %c0_4] : memref<68x1xf32, #tpu.memory_space<vmem>>, vector<4x1xf32>
    %c0_5 = arith.constant 0 : index
    %c0_6 = arith.constant 0 : index
    %4 = vector.load %arg2[%c0_5, %c0_6] : memref<32x4xf32, #tpu.memory_space<vmem>>, vector<32x4xf32>
    %cst = arith.constant dense<0.000000e+00> : vector<32x128xf32>
    %5 = tpu.matmul %4, %0, %cst {dimension_numbers = #tpu.dot_dimension_numbers<[1], [0], [0], [1], [0, 0, 1, 1], [], []>} : vector<32x4xf32>, vector<4x128xf32>, vector<32x128xf32> -> vector<32x128xf32>
    %6 = vector.broadcast %1 : vector<32x1xf32> to vector<32x128xf32>
    %7 = arith.addf %5, %6 : vector<32x128xf32>
    %cst_7 = arith.constant 0.000000e+00 : f32
    %8 = vector.broadcast %cst_7 : f32 to vector<32x128xf32>
    %9 = arith.maximumf %7, %8 : vector<32x128xf32>
    %c0_8 = arith.constant 0 : index
    %c0_9 = arith.constant 0 : index
    %10 = vector.load %arg3[%c0_8, %c0_9] : memref<32x32xf32, #tpu.memory_space<vmem>>, vector<32x32xf32>
    %cst_10 = arith.constant dense<0.000000e+00> : vector<32x128xf32>
    %11 = tpu.matmul %10, %9, %cst_10 {dimension_numbers = #tpu.dot_dimension_numbers<[1], [0], [0], [1], [0, 0, 1, 1], [], []>} : vector<32x32xf32>, vector<32x128xf32>, vector<32x128xf32> -> vector<32x128xf32>
    %12 = vector.broadcast %2 : vector<32x1xf32> to vector<32x128xf32>
    %13 = arith.addf %11, %12 : vector<32x128xf32>
    %cst_11 = arith.constant 0.000000e+00 : f32
    %14 = vector.broadcast %cst_11 : f32 to vector<32x128xf32>
    %15 = arith.maximumf %13, %14 : vector<32x128xf32>
    %c0_12 = arith.constant 0 : index
    %c0_13 = arith.constant 0 : index
    %16 = vector.load %arg4[%c0_12, %c0_13] : memref<4x32xf32, #tpu.memory_space<vmem>>, vector<4x32xf32>
    %cst_14 = arith.constant dense<0.000000e+00> : vector<4x128xf32>
    %17 = tpu.matmul %16, %15, %cst_14 {dimension_numbers = #tpu.dot_dimension_numbers<[1], [0], [0], [1], [0, 0, 1, 1], [], []>} : vector<4x32xf32>, vector<32x128xf32>, vector<4x128xf32> -> vector<4x128xf32>
    %18 = vector.broadcast %3 : vector<4x1xf32> to vector<4x128xf32>
    %19 = arith.addf %17, %18 : vector<4x128xf32>
    %20 = tpu.iota {dimensions = array<i32: 0>} : vector<4x128xi32>
    %c2_i32 = arith.constant 2 : i32
    %21 = vector.broadcast %c2_i32 : i32 to vector<4x128xi32>
    %22 = arith.cmpi slt, %20, %21 : vector<4x128xi32>
    %cst_15 = arith.constant 0.000000e+00 : f32
    %23 = vector.broadcast %cst_15 : f32 to vector<4x128xf32>
    %24 = arith.select %22, %23, %19 : vector<4x128xi1>, vector<4x128xf32>
    %25 = math.exp %24 : vector<4x128xf32>
    %26 = arith.select %22, %19, %25 : vector<4x128xi1>, vector<4x128xf32>
    %c0_16 = arith.constant 0 : index
    %c0_17 = arith.constant 0 : index
    %27 = vector.load %arg6[%c0_16, %c0_17] : memref<4x128xf32, #tpu.memory_space<vmem>>, vector<4x128xf32>
    tpu.vector_store %arg6[%c0_16, %c0_17], %26 {strides = array<i32>} : memref<4x128xf32, #tpu.memory_space<vmem>>, vector<4x128xf32>,
    return
  }
  func.func @transform_0(%arg0: i32) -> (i32, i32) {
    %c0_i32 = arith.constant 0 : i32
    %c0_i32_0 = arith.constant 0 : i32
    return %c0_i32, %arg0 : i32, i32
  }
  func.func @transform_1(%arg0: i32) -> (i32, i32) {
    %c0_i32 = arith.constant 0 : i32
    %c0_i32_0 = arith.constant 0 : i32
    %c0_i32_1 = arith.constant 0 : i32
    return %c0_i32, %c0_i32_0 : i32, i32
  }
  func.func @transform_2(%arg0: i32) -> (i32, i32) {
    %c0_i32 = arith.constant 0 : i32
    %c0_i32_0 = arith.constant 0 : i32
    %c0_i32_1 = arith.constant 0 : i32
    return %c0_i32, %c0_i32_0 : i32, i32
  }
  func.func @transform_3(%arg0: i32) -> (i32, i32) {
    %c0_i32 = arith.constant 0 : i32
    %c0_i32_0 = arith.constant 0 : i32
    %c0_i32_1 = arith.constant 0 : i32
    return %c0_i32, %c0_i32_0 : i32, i32
  }
  func.func @transform_4(%arg0: i32) -> (i32, i32) {
    %c0_i32 = arith.constant 0 : i32
    %c0_i32_0 = arith.constant 0 : i32
    %c0_i32_1 = arith.constant 0 : i32
    return %c0_i32, %c0_i32_0 : i32, i32
  }
  func.func @transform_5(%arg0: i32) -> (i32, i32) {
    %c0_i32 = arith.constant 0 : i32
    %c0_i32_0 = arith.constant 0 : i32
    return %c0_i32, %arg0 : i32, i32
  }
}

</mosaic_0001>

<bundles_post_ra>
// kernel: policy_net_forward.1
= control target key start
LH: loop header
LB: loop body
LE: loop exit
PB: predicated region body
PF: predicated region fallthrough
CT: control target
= control target key end

     0   :  { %vm67_vm0 = vcmask 1043456   ;;  %vm54_vm1 = vcmask 31744   ;;  %v460_v3 = vmov 0   ;;  %vm184_vm2 = vcmask 261120   ;;  %s563_s0 = inlined_call_operand.vmem [shape: f32[4,128], index: 0, kind: input, shape index: {}]   ;;  %s564_s1 = inlined_call_operand.vmem [shape: f32[32,4], index: 1, kind: input, shape index: {}]   ;;  %s565_s4 = inlined_call_operand.vmem [shape: f32[68,1], index: 4, kind: input, shape index: {}]   ;;  %s566_s2 = inlined_call_operand.vmem [shape: f32[32,32], index: 2, kind: input, shape index: {}]   ;;  %s567_s3 = inlined_call_operand.vmem [shape: f32[4,32], index: 3, kind: input, shape index: {}]   ;;  %s568_s5 = inlined_call_operand.vmem [shape: f32[4,128], index: 5, kind: output, shape index: {}]  }
   0x1   :  { %v20_v0 = vld [vmem:[%s563_s0] sm:$0xf]  ;;  %v31_v2 = vld [vmem:[%s564_s1 + $0x8] sm:$0xff]  ;;  %456 = vset.pattern.permute.xlu0 %v460_v3  ;;  %457 = vset.pattern.permute.xlu1 %v460_v3  ;;  %v32_v4 = vld [vmem:[%s564_s1 + $0x10] sm:$0xff]  ;;  %v461_v37 = vmov 0.0|0.0   ;;  %vm462_vm3 = vmmov 0   ;;  %v365_v58 = vlaneseq }
   0x2   :  { %v30_v1 = vld [vmem:[%s564_s1] sm:$0xff]  ;;  %405 = vmatprep.subr.msk.mxu0 %vm67_vm0, %v20_v0  ;;  %v23_v6 = vld [vmem:[%s565_s4 + $0x10] sm:$0xff]  ;;  %v22_v7 = vld [vmem:[%s565_s4 + $0x8] sm:$0xff]  ;;  %v463_v38 = vmov 0.0  }
   0x3   :  { %407 = vmatprep.mubr.msk.f32.mxu0 %vm54_vm1, %v30_v1  ;;  %v21_v5 = vld [vmem:[%s565_s4] sm:$0xff]  ;;  %406 = vmatpush3.msk.msra.mxu0 %vm67_vm0, %v20_v0  ;;  %v33_v8 = vld [vmem:[%s564_s1 + $0x18] sm:$0xff]  ;;  %v26_v11 = vld [vmem:[%s565_s4 + $0x28] sm:$0xff]  ;;  %v366_v59 = vshrl.u32 %v365_v58, 7 }
   0x4   :  { %36 = vperm.xlu0 %456, %v21_v5   ;;  %408 = vmatmul.mubr.msk.f32.vlgmr.msra.gmra.mrb[0].mxu0 %vm54_vm1, %v31_v2  ;;  %v24_v9 = vld [vmem:[%s565_s4 + $0x18] sm:$0xff]  ;;  %v25_v10 = vld [vmem:[%s565_s4 + $0x20] sm:$0xff]  ;;  %v27_v12 = vld [vmem:[%s565_s4 + $0x30] sm:$0xff] }
   0x5   :  { %46 = vperm.xlu1 %457, %v23_v6   ;;  %410 = vmatprep.mubr.msk.f32.mxu0 %vm54_vm1, %v32_v4  ;;  %v28_v13 = vld [vmem:[%s565_s4 + $0x38] sm:$0xff]  ;;  %v29_v14 = vld [vmem:[%s565_s4 + $0x40] sm:$0xf]  ;;  %v161_v34 = vld [vmem:[%s566_s2 + $0x8] sm:$0xff]  ;;  %vm367_vm4 = vcmp.lt.s32.totalorder %v366_v59, 2 }
   0x6   :  { %v160_v15 = vld [vmem:[%s566_s2] sm:$0xff]  ;;  %v162_v35 = vld [vmem:[%s566_s2 + $0x10] sm:$0xff]  ;;  %v163_v36 = vld [vmem:[%s566_s2 + $0x18] sm:$0xff]  ;;  %446 = vmatprep.subr.bf16.mxu0 %v461_v37 }
   0x7   :  { %421 = vmatprep.mubr.msk.f32.mxu1 %vm184_vm2, %v160_v15  ;;  %v286_v57 = vld [vmem:[%s567_s3] sm:$0xf] }
   0x8   :  { %41 = vperm.xlu0 %456, %v22_v7   ;;  %411 = vmatmul.mubr.msk.f32.gmra.mrb[2].mxu0 %vm54_vm1, %v33_v8 }
   0x9   :  { %51 = vperm.xlu1 %457, %v24_v9   ;;  %435 = vmatprep.mubr.msk.f32.mxu0 %vm462_vm3, %v463_v38 }
   0xc   :  { %166 = vperm.xlu0 %456, %v25_v10  }
   0xd   :  { %171 = vperm.xlu1 %457, %v26_v11  }
  0x10   :  { %176 = vperm.xlu0 %456, %v27_v12  }
  0x11   :  { %181 = vperm.xlu1 %457, %v28_v13  }
  0x14   :  { %289 = vperm.xlu0 %456, %v29_v14  }
  0x83   :  { %v37_v16 = vpop.permute.xlu0 %36 }
  0x84   :  { %v47_v17 = vpop.permute.xlu1 %46 }
  0x87   :  { %v42_v18 = vpop.permute.xlu0 %41 }
  0x88   :  { %v52_v24 = vpop.permute.xlu1 %51 }
  0x8b   :  { %v167_v40 = vpop.permute.xlu0 %166 }
  0x8c   :  { %v172_v39 = vpop.permute.xlu1 %171 }
  0x8f   :  { %v177_v49 = vpop.permute.xlu0 %176 }
  0x90   :  { %v182_v46 = vpop.permute.xlu1 %181 }
  0x93   :  { %v290_v60 = vpop.permute.xlu0 %289 }
  0xd7   :  { %v409_v19 = vpop.f32.mrb[0].mxu0 }
  0xd8   :  { %v143_v20 = vadd.f32 %v409_v19, %v42_v18  ;;  %v137_v21 = vpop.f32.mrb[1].mxu0 }
  0xd9   :  { %v138_v22 = vadd.f32 %v137_v21, %v37_v16 }
  0xda   :  { %v157_v23 = vmax.f32 %v143_v20, 0.0 }
  0xdb   :  { %v156_v25 = vmax.f32 %v138_v22, 0.0  ;;  %v412_v26 = vpop.f32.mrb[2].mxu0 }
  0xdc   :  { %v153_v27 = vadd.f32 %v412_v26, %v52_v24  ;;  %v147_v28 = vpop.f32.mrb[3].mxu0 }
  0xdd   :  { %v148_v29 = vadd.f32 %v147_v28, %v47_v17  ;;  %v438_v30 = vpack.c.bf16 %v157_v23, %v156_v25 }
  0xde   :  { %v159_v31 = vmax.f32 %v153_v27, 0.0 }
  0xdf   :  { %v158_v32 = vmax.f32 %v148_v29, 0.0  ;;  %439 = vmatprep.subr.bf16.mxu1 %v438_v30 }
  0xe0   :  { %441 = vmatpush3.bf16.msra.mxu1 %v438_v30 }
  0xe1   :  { %v442_v33 = vpack.c.bf16 %v159_v31, %v158_v32 }
  0xe3   :  { %443 = vmatprep.subr.bf16.mxu1 %v442_v33 }
  0xe4   :  { %445 = vmatpush3.bf16.msra.mxu1 %v442_v33 }
  0xe7   :  { %422 = vmatmul.mubr.msk.f32.vlgmr.msra.gmra.mrb[0].mxu1 %vm184_vm2, %v161_v34 }
  0xe8   :  { %424 = vmatprep.mubr.msk.f32.mxu1 %vm184_vm2, %v162_v35 }
  0xeb   :  { %425 = vmatmul.mubr.msk.f32.gmra.mrb[2].mxu1 %vm184_vm2, %v163_v36 }
 0x1ba   :  { %v423_v41 = vpop.f32.mrb[0].mxu1 }
 0x1bb   :  { %v269_v42 = vadd.f32 %v423_v41, %v172_v39  ;;  %v263_v43 = vpop.f32.mrb[1].mxu1 }
 0x1bc   :  { %v264_v44 = vadd.f32 %v263_v43, %v167_v40 }
 0x1bd   :  { %v283_v45 = vmax.f32 %v269_v42, 0.0 }
 0x1be   :  { %v282_v47 = vmax.f32 %v264_v44, 0.0  ;;  %v426_v48 = vpop.f32.mrb[2].mxu1 }
 0x1bf   :  { %v279_v50 = vadd.f32 %v426_v48, %v182_v46  ;;  %v273_v51 = vpop.f32.mrb[3].mxu1 }
 0x1c0   :  { %v447_v52 = vpack.c.bf16 %v283_v45, %v282_v47  ;;  %v274_v53 = vadd.f32 %v273_v51, %v177_v49 }
 0x1c1   :  { %v285_v54 = vmax.f32 %v279_v50, 0.0 }
 0x1c2   :  { %v284_v55 = vmax.f32 %v274_v53, 0.0  ;;  %448 = vmatpush3.bf16.msra.mxu0 %v447_v52 }
 0x1c3   :  { %449 = vmatprep.subr.bf16.mxu0 %v461_v37 }
 0x1c4   :  { %v450_v56 = vpack.c.bf16 %v285_v54, %v284_v55 }
 0x1c6   :  { %451 = vmatpush3.bf16.msra.mxu0 %v450_v56 }
 0x1c9   :  { %436 = vmatmul.mubr.msk.f32.vlgmr.msra.gmra.mrb[4].mxu0 %vm184_vm2, %v286_v57 }
 0x29c   :  { %v361_v61 = vpop.f32.mrb[4].mxu0 }
 0x29d   :  { %v362_v62 = vadd.f32 %v361_v61, %v290_v60  ;;  %v437_v63 = vpop.f32.mrb[5].mxu0 }
 0x29f   :  { %v368_v0 = vsel %vm367_vm4, 0.0, %v362_v62 }
 0x2a0   :  { %v369_v1 = vmul.f32 1.442695, %v368_v0 }
 0x2a2   :  { %458 = vpow2.f32 %v369_v1 }
 0x2ac   :  { %v459_v2 = vpop.eup %458 }
 0x2ad   :  { %v371_v3 = vsel %vm367_vm4, %v362_v62, %v459_v2 }
 0x2ae   :  { %372 = vst [vmem:[%s568_s5] sm:$0xf] %v371_v3 }

</bundles_post_ra>
